<compile_context>
chip_gen: v5e
topology: v5e:2x2
jax: 0.10.0
libtpu: 0.0.40
codegen_flags: <defaults>
</compile_context>

<pallas_src>
import functools

import jax
import jax.numpy as jnp
from jax.experimental import pallas as pl
from jax.experimental.pallas import tpu as pltpu

_LANE = 128      # TPU lane width (last-dim alignment)
_SUBLANE = 8     # sublane alignment for the second-to-last dim
_MAX_TILE = 512  # streaming batch tile (rows per grid step) for large B


def _round_up(x, m):
    return (x + m - 1) // m * m


def _choose_tile(batch):
    # Single tile up to 512 rows; otherwise stream 512-row tiles.
    if batch <= _MAX_TILE:
        return _round_up(batch, _SUBLANE)
    return _MAX_TILE


def _critic_kernel(x_ref, w1_ref, b1_ref, w2_ref, b2_ref, w3_ref, b3_ref,
                   out_ref):
    # Layer 1: MXU matmul, f32 accumulate, f32 bias + ReLU epilogue.
    h1 = jnp.dot(x_ref[...], w1_ref[...], preferred_element_type=jnp.float32)
    h1 = jnp.maximum(h1 + b1_ref[...], 0.0)

    # Layer 2: cast activations to the weight dtype (bf16 path) for the MXU,
    # keep the accumulator / epilogue in f32.
    h2 = jnp.dot(h1.astype(w2_ref.dtype), w2_ref[...],
                 preferred_element_type=jnp.float32)
    h2 = jnp.maximum(h2 + b2_ref[...], 0.0)

    # Layer 3 (fc2 -> 1): VPU elementwise mul + lane reduction instead of a
    # 1-lane MXU matmul (w3 is passed as a [1, fc2] row).
    v = jnp.sum(h2 * w3_ref[...].astype(jnp.float32), axis=-1, keepdims=True)
    out_ref[...] = (v + b3_ref[...]).astype(out_ref.dtype)


@functools.partial(jax.jit, static_argnames=("compute_dtype",))
def critic_forward(state, w1, b1, w2, b2, w3, b3,
                   *, compute_dtype=jnp.float32):
    """state: [B, input_dims] -> value: [B, 1] float32.

    w1: [Din, fc1], b1: [1, fc1], w2: [fc1, fc2], b2: [1, fc2],
    w3: [fc2, 1],  b3: [1, 1]   (weights already transposed to [in, out]).
    `compute_dtype` controls the matmul operand dtype (f32 or bf16);
    accumulation and the bias/ReLU epilogue always stay f32.
    """
    B, Din = state.shape
    F1 = w1.shape[1]
    F2 = w2.shape[1]

    # Lane-align feature dims (zero padding is numerically inert).
    Dp = _round_up(Din, _LANE)
    F1p = _round_up(F1, _LANE)
    F2p = _round_up(F2, _LANE)

    TB = _choose_tile(B)
    Bp = _round_up(B, TB)
    nb = Bp // TB

    f32 = jnp.float32
    xp = jnp.zeros((Bp, Dp), f32).at[:B, :Din].set(state.astype(f32))
    xp = xp.astype(compute_dtype)
    w1p = jnp.zeros((Dp, F1p), f32).at[:Din, :F1].set(w1).astype(compute_dtype)
    w2p = jnp.zeros((F1p, F2p), f32).at[:F1, :F2].set(w2).astype(compute_dtype)
    w3p = (jnp.zeros((1, F2p), f32).at[:, :F2].set(w3.reshape(1, F2))
           .astype(compute_dtype))
    b1p = jnp.zeros((1, F1p), f32).at[:, :F1].set(b1)
    b2p = jnp.zeros((1, F2p), f32).at[:, :F2].set(b2)
    b3p = b3.reshape(1, 1).astype(f32)

    # Advisory cost hint so XLA can overlap this custom call with neighbours.
    item = jnp.dtype(compute_dtype).itemsize
    flops = 2 * B * (Din * F1 + F1 * F2 + F2)
    bytes_accessed = (Bp * Dp * item                       # streamed activations
                      + (Dp * F1p + F1p * F2p + F2p) * item  # weights (once)
                      + (F1p + F2p + 1) * 4                  # biases
                      + Bp * 1 * 4)                          # output
    cost = pl.CostEstimate(flops=flops, transcendentals=0,
                           bytes_accessed=bytes_accessed)

    batch_map = lambda i: (i, 0)   # tile along batch
    const_map = lambda i: (0, 0)   # weights/biases resident across grid steps

    out_padded = pl.pallas_call(
        _critic_kernel,
        out_shape=jax.ShapeDtypeStruct((Bp, 1), jnp.float32),
        grid=(nb,),
        in_specs=[
            pl.BlockSpec((TB, Dp), batch_map),     # x tile (streamed)
            pl.BlockSpec((Dp, F1p), const_map),    # w1
            pl.BlockSpec((1, F1p), const_map),     # b1
            pl.BlockSpec((F1p, F2p), const_map),   # w2
            pl.BlockSpec((1, F2p), const_map),     # b2
            pl.BlockSpec((1, F2p), const_map),     # w3 (row)
            pl.BlockSpec((1, 1), const_map),       # b3
        ],
        out_specs=pl.BlockSpec((TB, 1), batch_map),
        compiler_params=pltpu.CompilerParams(
            dimension_semantics=("parallel",),     # megacore on v7x
            vmem_limit_bytes=32 * 1024 * 1024,     # fits v7x 64 MiB VMEM
        ),
        cost_estimate=cost,
    )(xp, w1p, b1p, w2p, b2p, w3p, b3p)

    return out_padded[:B]


def init_params(key, input_dims, fc1_dims, fc2_dims):
    """PyTorch-Linear-style init (uniform +-1/sqrt(fan_in)).

    Weights stored transposed to [in, out]; biases as [1, out] rows.
    """
    ks = jax.random.split(key, 6)

    def lin(kw, kb, fan_in, fan_out):
        bound = 1.0 / jnp.sqrt(jnp.float32(fan_in))
        w = jax.random.uniform(kw, (fan_in, fan_out), jnp.float32, -bound, bound)
        b = jax.random.uniform(kb, (1, fan_out), jnp.float32, -bound, bound)
        return w, b

    w1, b1 = lin(ks[0], ks[1], input_dims, fc1_dims)
    w2, b2 = lin(ks[2], ks[3], fc1_dims, fc2_dims)
    w3, b3 = lin(ks[4], ks[5], fc2_dims, 1)
    return w1, b1, w2, b2, w3, b3


def _reference(state, params):
    w1, b1, w2, b2, w3, b3 = params
    h = jnp.maximum(state @ w1 + b1, 0.0)
    h = jnp.maximum(h @ w2 + b2, 0.0)
    return h @ w3 + b3


if __name__ == "__main__":
    input_dims, fc1_dims, fc2_dims = 32, 64, 64

    key = jax.random.PRNGKey(0)
    k_small, k_big, k_params = jax.random.split(key, 3)
    params = init_params(k_params, input_dims, fc1_dims, fc2_dims)

    # Small, module-consistent shapes (single grid step).
    state = jax.random.normal(k_small, (8, input_dims), jnp.float32)
    value = jax.block_until_ready(critic_forward(state, *params))
    ref = _reference(state, params)
    assert value.shape == (8, 1)
    assert jnp.allclose(value, ref, atol=2e-2, rtol=2e-2)

    # Larger batch exercising the streaming batch grid (f32 path).
    state_big = jax.random.normal(k_big, (1024, input_dims), jnp.float32)
    value_big = jax.block_until_ready(critic_forward(state_big, *params))
    ref_big = _reference(state_big, params)
    assert value_big.shape == (1024, 1)
    assert jnp.allclose(value_big, ref_big, atol=2e-2, rtol=2e-2)

    # bf16 weight/activation path (f32 accumulation), looser tolerance.
    value_bf16 = jax.block_until_ready(
        critic_forward(state_big, *params, compute_dtype=jnp.bfloat16))
    assert value_bf16.shape == (1024, 1)
    assert jnp.allclose(value_bf16, ref_big, atol=2e-1, rtol=2e-1)

    print("KERNEL_OK")
</pallas_src>

<mosaic_0001>
module attributes {stable_mosaic.version = 11 : i64} {
  func.func @_critic_kernel(%arg0: i32, %arg1: memref<8x128xf32, #tpu.memory_space<vmem>>, %arg2: memref<128x128xf32, #tpu.memory_space<vmem>>, %arg3: memref<1x128xf32, #tpu.memory_space<vmem>>, %arg4: memref<128x128xf32, #tpu.memory_space<vmem>>, %arg5: memref<1x128xf32, #tpu.memory_space<vmem>>, %arg6: memref<1x128xf32, #tpu.memory_space<vmem>>, %arg7: memref<1x1xf32, #tpu.memory_space<vmem>>, %arg8: memref<8x1xf32, #tpu.memory_space<vmem>>) attributes {dimension_semantics = [#tpu.dimension_semantics<parallel>], iteration_bounds = array<i64: 1>, scalar_prefetch = 0 : i64, scratch_operands = 0 : i64, tpu.core_type = #tpu.core_type<tc>, window_params = [{transform_indices = @transform_0, window_bounds = array<i64: 8, 128>}, {pipeline_mode = #tpu.pipeline_mode<synchronous>, transform_indices = @transform_1, window_bounds = array<i64: 128, 128>}, {pipeline_mode = #tpu.pipeline_mode<synchronous>, transform_indices = @transform_2, window_bounds = array<i64: 1, 128>}, {pipeline_mode = #tpu.pipeline_mode<synchronous>, transform_indices = @transform_3, window_bounds = array<i64: 128, 128>}, {pipeline_mode = #tpu.pipeline_mode<synchronous>, transform_indices = @transform_4, window_bounds = array<i64: 1, 128>}, {pipeline_mode = #tpu.pipeline_mode<synchronous>, transform_indices = @transform_5, window_bounds = array<i64: 1, 128>}, {pipeline_mode = #tpu.pipeline_mode<synchronous>, transform_indices = @transform_6, window_bounds = array<i64: 1, 1>}, {transform_indices = @transform_7, window_bounds = array<i64: 8, 1>}]} {
    %c0 = arith.constant 0 : index
    %c0_0 = arith.constant 0 : index
    %0 = vector.load %arg1[%c0, %c0_0] : memref<8x128xf32, #tpu.memory_space<vmem>>, vector<8x128xf32>
    %c0_1 = arith.constant 0 : index
    %c0_2 = arith.constant 0 : index
    %1 = vector.load %arg2[%c0_1, %c0_2] : memref<128x128xf32, #tpu.memory_space<vmem>>, vector<128x128xf32>
    %cst = arith.constant dense<0.000000e+00> : vector<8x128xf32>
    %2 = tpu.matmul %0, %1, %cst {dimension_numbers = #tpu.dot_dimension_numbers<[1], [0], [0], [1], [0, 0, 1, 1], [], []>} : vector<8x128xf32>, vector<128x128xf32>, vector<8x128xf32> -> vector<8x128xf32>
    %c0_3 = arith.constant 0 : index
    %c0_4 = arith.constant 0 : index
    %3 = vector.load %arg3[%c0_3, %c0_4] : memref<1x128xf32, #tpu.memory_space<vmem>>, vector<1x128xf32>
    %4 = vector.broadcast %3 : vector<1x128xf32> to vector<8x128xf32>
    %5 = arith.addf %2, %4 : vector<8x128xf32>
    %cst_5 = arith.constant 0.000000e+00 : f32
    %6 = vector.broadcast %cst_5 : f32 to vector<8x128xf32>
    %7 = arith.maximumf %5, %6 : vector<8x128xf32>
    %c0_6 = arith.constant 0 : index
    %c0_7 = arith.constant 0 : index
    %8 = vector.load %arg4[%c0_6, %c0_7] : memref<128x128xf32, #tpu.memory_space<vmem>>, vector<128x128xf32>
    %cst_8 = arith.constant dense<0.000000e+00> : vector<8x128xf32>
    %9 = tpu.matmul %7, %8, %cst_8 {dimension_numbers = #tpu.dot_dimension_numbers<[1], [0], [0], [1], [0, 0, 1, 1], [], []>} : vector<8x128xf32>, vector<128x128xf32>, vector<8x128xf32> -> vector<8x128xf32>
    %c0_9 = arith.constant 0 : index
    %c0_10 = arith.constant 0 : index
    %10 = vector.load %arg5[%c0_9, %c0_10] : memref<1x128xf32, #tpu.memory_space<vmem>>, vector<1x128xf32>
    %11 = vector.broadcast %10 : vector<1x128xf32> to vector<8x128xf32>
    %12 = arith.addf %9, %11 : vector<8x128xf32>
    %cst_11 = arith.constant 0.000000e+00 : f32
    %13 = vector.broadcast %cst_11 : f32 to vector<8x128xf32>
    %14 = arith.maximumf %12, %13 : vector<8x128xf32>
    %c0_12 = arith.constant 0 : index
    %c0_13 = arith.constant 0 : index
    %15 = vector.load %arg6[%c0_12, %c0_13] : memref<1x128xf32, #tpu.memory_space<vmem>>, vector<1x128xf32>
    %16 = vector.broadcast %15 : vector<1x128xf32> to vector<8x128xf32>
    %17 = arith.mulf %14, %16 : vector<8x128xf32>
    %cst_14 = arith.constant dense<0.000000e+00> : vector<8xf32>
    %18 = vector.multi_reduction <add>, %17, %cst_14 [1] : vector<8x128xf32> to vector<8xf32>
    %19 = vector.shape_cast %18 : vector<8xf32> to vector<8x1xf32>
    %c0_15 = arith.constant 0 : index
    %c0_16 = arith.constant 0 : index
    %20 = vector.load %arg7[%c0_15, %c0_16] : memref<1x1xf32, #tpu.memory_space<vmem>>, vector<1x1xf32>
    %21 = vector.broadcast %20 : vector<1x1xf32> to vector<8x1xf32>
    %22 = arith.addf %19, %21 : vector<8x1xf32>
    %c0_17 = arith.constant 0 : index
    %c0_18 = arith.constant 0 : index
    %23 = vector.load %arg8[%c0_17, %c0_18] : memref<8x1xf32, #tpu.memory_space<vmem>>, vector<8x1xf32>
    tpu.vector_store %arg8[%c0_17, %c0_18], %22 {strides = array<i32>} : memref<8x1xf32, #tpu.memory_space<vmem>>, vector<8x1xf32>,
    return
  }
  func.func @transform_0(%arg0: i32) -> (i32, i32) {
    %c0_i32 = arith.constant 0 : i32
    %c0_i32_0 = arith.constant 0 : i32
    return %arg0, %c0_i32 : i32, i32
  }
  func.func @transform_1(%arg0: i32) -> (i32, i32) {
    %c0_i32 = arith.constant 0 : i32
    %c0_i32_0 = arith.constant 0 : i32
    %c0_i32_1 = arith.constant 0 : i32
    return %c0_i32, %c0_i32_0 : i32, i32
  }
  func.func @transform_2(%arg0: i32) -> (i32, i32) {
    %c0_i32 = arith.constant 0 : i32
    %c0_i32_0 = arith.constant 0 : i32
    %c0_i32_1 = arith.constant 0 : i32
    return %c0_i32, %c0_i32_0 : i32, i32
  }
  func.func @transform_3(%arg0: i32) -> (i32, i32) {
    %c0_i32 = arith.constant 0 : i32
    %c0_i32_0 = arith.constant 0 : i32
    %c0_i32_1 = arith.constant 0 : i32
    return %c0_i32, %c0_i32_0 : i32, i32
  }
  func.func @transform_4(%arg0: i32) -> (i32, i32) {
    %c0_i32 = arith.constant 0 : i32
    %c0_i32_0 = arith.constant 0 : i32
    %c0_i32_1 = arith.constant 0 : i32
    return %c0_i32, %c0_i32_0 : i32, i32
  }
  func.func @transform_5(%arg0: i32) -> (i32, i32) {
    %c0_i32 = arith.constant 0 : i32
    %c0_i32_0 = arith.constant 0 : i32
    %c0_i32_1 = arith.constant 0 : i32
    return %c0_i32, %c0_i32_0 : i32, i32
  }
  func.func @transform_6(%arg0: i32) -> (i32, i32) {
    %c0_i32 = arith.constant 0 : i32
    %c0_i32_0 = arith.constant 0 : i32
    %c0_i32_1 = arith.constant 0 : i32
    return %c0_i32, %c0_i32_0 : i32, i32
  }
  func.func @transform_7(%arg0: i32) -> (i32, i32) {
    %c0_i32 = arith.constant 0 : i32
    %c0_i32_0 = arith.constant 0 : i32
    return %arg0, %c0_i32 : i32, i32
  }
}

</mosaic_0001>

<bundles_post_ra>
// kernel: critic_forward.1
= control target key start
LH: loop header
LB: loop body
LE: loop exit
PB: predicated region body
PF: predicated region fallthrough
CT: control target
= control target key end

     0   :  { %vm123_vm0 = vcmask 7168   ;;  %s287_s1 = inlined_call_operand.vmem [shape: f32[128,128], index: 1, kind: input, shape index: {}]   ;;  %s288_s3 = inlined_call_operand.vmem [shape: f32[128,128], index: 3, kind: input, shape index: {}]   ;;  %s289_s2 = inlined_call_operand.vmem [shape: f32[1,128], index: 2, kind: input, shape index: {}]   ;;  %s290_s0 = inlined_call_operand.vmem [shape: f32[8,128], index: 0, kind: input, shape index: {}]   ;;  %s291_s4 = inlined_call_operand.vmem [shape: f32[1,128], index: 4, kind: input, shape index: {}]   ;;  %s292_s5 = inlined_call_operand.vmem [shape: f32[1,128], index: 5, kind: input, shape index: {}]   ;;  %s293_s6 = inlined_call_operand.<no memory space> [shape: f32[1,1], index: 6, kind: input, shape index: {}]   ;;  %s294_s7 = inlined_call_operand.vmem [shape: f32[8,1], index: 7, kind: output, shape index: {}]  }
   0x1   :  { %v44_v0 = vld [vmem:[%s287_s1 + $0x78] sm:$0xff]  ;;  %v43_v1 = vld [vmem:[%s287_s1 + $0x70] sm:$0xff]  ;;  %v42_v2 = vld [vmem:[%s287_s1 + $0x68] sm:$0xff]  ;;  %v12_v37 = vstv %s293_s6 }
   0x2   :  { %49 = vmatpush.msra.mxu0 %v44_v0  ;;  %v41_v3 = vld [vmem:[%s287_s1 + $0x60] sm:$0xff]  ;;  %v85_v4 = vld [vmem:[%s288_s3 + $0x78] sm:$0xff]  ;;  %v84_v6 = vld [vmem:[%s288_s3 + $0x70] sm:$0xff]  ;;  %13 = vst [vmem:[#allocation2] sm:$0x1] %v12_v37 }
   0x3   :  { %v40_v5 = vld [vmem:[%s287_s1 + $0x58] sm:$0xff]  ;;  %90 = vmatpush.msra.mxu1 %v85_v4  ;;  %v83_v7 = vld [vmem:[%s288_s3 + $0x68] sm:$0xff]  ;;  %v39_v8 = vld [vmem:[%s287_s1 + $0x50] sm:$0xff] }
   0x4   :  { %50 = vmatpush.msra.mxu0 %v43_v1  ;;  %v82_v9 = vld [vmem:[%s288_s3 + $0x60] sm:$0xff]  ;;  %v38_v10 = vld [vmem:[%s287_s1 + $0x48] sm:$0xff]  ;;  %v81_v11 = vld [vmem:[%s288_s3 + $0x58] sm:$0xff] }
   0x5   :  { %91 = vmatpush.msra.mxu1 %v84_v6  ;;  %v37_v12 = vld [vmem:[%s287_s1 + $0x40] sm:$0xff]  ;;  %v80_v13 = vld [vmem:[%s288_s3 + $0x50] sm:$0xff]  ;;  %v36_v14 = vld [vmem:[%s287_s1 + $0x38] sm:$0xff] }
   0x6   :  { %51 = vmatpush.msra.mxu0 %v42_v2  ;;  %v79_v15 = vld [vmem:[%s288_s3 + $0x48] sm:$0xff]  ;;  %v35_v16 = vld [vmem:[%s287_s1 + $0x30] sm:$0xff]  ;;  %v78_v17 = vld [vmem:[%s288_s3 + $0x40] sm:$0xff] }
   0x7   :  { %92 = vmatpush.msra.mxu1 %v83_v7  ;;  %v34_v18 = vld [vmem:[%s287_s1 + $0x28] sm:$0xff]  ;;  %v77_v19 = vld [vmem:[%s288_s3 + $0x38] sm:$0xff]  ;;  %v33_v20 = vld [vmem:[%s287_s1 + $0x20] sm:$0xff] }
   0x8   :  { %52 = vmatpush.msra.mxu0 %v41_v3  ;;  %v76_v21 = vld [vmem:[%s288_s3 + $0x30] sm:$0xff]  ;;  %v32_v22 = vld [vmem:[%s287_s1 + $0x18] sm:$0xff]  ;;  %v75_v23 = vld [vmem:[%s288_s3 + $0x28] sm:$0xff] }
   0x9   :  { %93 = vmatpush.msra.mxu1 %v82_v9  ;;  %v31_v24 = vld [vmem:[%s287_s1 + $0x10] sm:$0xff]  ;;  %v74_v25 = vld [vmem:[%s288_s3 + $0x20] sm:$0xff]  ;;  %v30_v26 = vld [vmem:[%s287_s1 + $0x8] sm:$0xff] }
   0xa   :  { %53 = vmatpush.msra.mxu0 %v40_v5  ;;  %v73_v27 = vld [vmem:[%s288_s3 + $0x18] sm:$0xff]  ;;  %v29_v28 = vld [vmem:[%s287_s1] sm:$0xff]  ;;  %v72_v30 = vld [vmem:[%s288_s3 + $0x10] sm:$0xff] }
   0xb   :  { %94 = vmatpush.msra.mxu1 %v81_v11  ;;  %v28_v29 = vld [vmem:[%s290_s0] sm:$0xff]  ;;  %v71_v31 = vld [vmem:[%s288_s3 + $0x8] sm:$0xff] }
   0xc   :  { %54 = vmatpush.msra.mxu0 %v39_v8  ;;  %v70_v32 = vld [vmem:[%s288_s3] sm:$0xff] }
   0xd   :  { %95 = vmatpush.msra.mxu1 %v80_v13  ;;  %v129_v33 = vld [vmem:[%s289_s2] ss:$0 sm:$0xff] }
   0xe   :  { %55 = vmatpush.msra.mxu0 %v38_v10  ;;  %v130_v38 = vld [vmem:[%s291_s4] ss:$0 sm:$0xff] }
   0xf   :  { %96 = vmatpush.msra.mxu1 %v79_v15  ;;  %v131_v41 = vld [vmem:[%s292_s5] ss:$0 sm:$0xff] }
  0x10   :  { %56 = vmatpush.msra.mxu0 %v37_v12  ;;  %v132_v44 = vld [vmem:[#allocation2] ss:$0 sm:$0xff] }
  0x11   :  { %97 = vmatpush.msra.mxu1 %v78_v17 }
  0x12   :  { %57 = vmatpush.msra.mxu0 %v36_v14 }
  0x13   :  { %98 = vmatpush.msra.mxu1 %v77_v19 }
  0x14   :  { %58 = vmatpush.msra.mxu0 %v35_v16 }
  0x15   :  { %99 = vmatpush.msra.mxu1 %v76_v21 }
  0x16   :  { %59 = vmatpush.msra.mxu0 %v34_v18 }
  0x17   :  { %100 = vmatpush.msra.mxu1 %v75_v23 }
  0x18   :  { %60 = vmatpush.msra.mxu0 %v33_v20 }
  0x19   :  { %101 = vmatpush.msra.mxu1 %v74_v25 }
  0x1a   :  { %61 = vmatpush.msra.mxu0 %v32_v22 }
  0x1b   :  { %102 = vmatpush.msra.mxu1 %v73_v27 }
  0x1c   :  { %62 = vmatpush.msra.mxu0 %v31_v24 }
  0x1d   :  { %103 = vmatpush.msra.mxu1 %v72_v30 }
  0x1e   :  { %63 = vmatpush.msra.mxu0 %v30_v26 }
  0x1f   :  { %104 = vmatpush.msra.mxu1 %v71_v31 }
  0x20   :  { %64 = vmatpush.msra.mxu0 %v29_v28 }
  0x21   :  { %65 = vmatmul.f32.vlgmr.msra.gmra.mxu0 %v28_v29  ;;  %105 = vmatpush.msra.mxu1 %v70_v32 }
  0x9e   :  { %v66_v34 = vpop.f32.mrf.mxu0 }
  0x9f   :  { %v67_v35 = vadd.f32 %v129_v33, %v66_v34 }
  0xa1   :  { %v69_v36 = vmax.f32 %v67_v35, 0.0 }
  0xa3   :  { %106 = vmatmul.f32.vlgmr.msra.gmra.mxu1 %v69_v36 }
 0x120   :  { %v107_v39 = vpop.f32.mrf.mxu1 }
 0x121   :  { %v108_v40 = vadd.f32 %v130_v38, %v107_v39 }
 0x123   :  { %v110_v42 = vmax.f32 %v108_v40, 0.0 }
 0x125   :  { %v115_v43 = vmul.f32 %v131_v41, %v110_v42 }
 0x127   :  { %116 = vadd.xlane.f32.xlu0 %v115_v43 }
 0x19a   :  { %v117_v45 = vpop.xlane.xlu0 %116 }
 0x19b   :  { %v122_v46 = vadd.f32 %v132_v44, %v117_v45 }
 0x19d   :  { %124 = vst.msk [vmem:[%s294_s7] sm:$0xff] %vm123_vm0, %v122_v46 }

</bundles_post_ra>
